<compile_context>
chip_gen: v6e
topology: v6e:2x2x1
jax: 0.10.0
libtpu: 0.0.40
codegen_flags: <defaults>
</compile_context>

<pallas_src>
import jax
import jax.numpy as jnp
from jax.experimental import pallas as pl
from jax.experimental.pallas import tpu as pltpu

_LANE = 128
_SUBLANE = 8
_MAX_LANES = 32 * _LANE                 # cap lane width at 4096 (32 vregs wide)
_TARGET_BLOCK_BYTES = 2 * 1024 * 1024   # ~2 MiB/block; x2 operands x2 buffers ≈ 8 MiB VMEM


def _identity_kernel(x_ref, o_ref):
    # Straight VMEM tile copy (elementwise identity).
    o_ref[...] = x_ref[...]


def _pick_lane_width(total: int):
    """Largest multiple of 128 (≤ cap) that divides `total`, else None."""
    max_m = min(_MAX_LANES, total) // _LANE
    for m in range(max_m, 0, -1):
        lane = m * _LANE
        if total % lane == 0:
            return lane
    return None


def _copy_2d(x2: jax.Array) -> jax.Array:
    """Tiled, aliased identity copy of a 2D slab."""
    R, C = x2.shape
    dtype_bytes = jnp.dtype(x2.dtype).itemsize

    # Row tile sized for ~_TARGET_BLOCK_BYTES per block, multiple of 8
    # sublanes (or the full row extent when R is small — full dim is allowed).
    target_rows = max(1, _TARGET_BLOCK_BYTES // max(1, C * dtype_bytes))
    tile_r = max(_SUBLANE, (target_rows // _SUBLANE) * _SUBLANE)
    tile_r = min(R, tile_r)

    grid = (pl.cdiv(R, tile_r),)  # partial last block handled by Pallas

    return pl.pallas_call(
        _identity_kernel,
        out_shape=jax.ShapeDtypeStruct((R, C), x2.dtype),
        grid_spec=pltpu.PrefetchScalarGridSpec(
            num_scalar_prefetch=0,
            grid=grid,
            in_specs=[pl.BlockSpec((tile_r, C), lambda i: (i, 0))],
            out_specs=pl.BlockSpec((tile_r, C), lambda i: (i, 0)),
        ),
        # Alias output 0 to input 0: with a donated caller buffer this is an
        # in-place no-op at the HBM level (no second allocation / writeback).
        input_output_aliases={0: 0},
        compiler_params=pltpu.CompilerParams(
            dimension_semantics=("parallel",),
        ),
    )(x2)


def identity(x: jax.Array) -> jax.Array:
    """Identity.forward: pure pass-through — no data movement at all."""
    return x


def identity_copy(x: jax.Array) -> jax.Array:
    """Pallas identity that materializes a buffer (aliased, lane-dense copy)."""
    orig_shape = x.shape
    total = x.size

    if total == 0:
        return x

    lane = _pick_lane_width(total)
    if lane is not None:
        # Lane-dense slab: every store is a full-width (unmasked) vst.
        x2 = x.reshape(total // lane, lane)
    elif x.ndim >= 2:
        # Fallback: natural (rows, last-dim) layout, rows tiled with cdiv.
        x2 = x.reshape(-1, orig_shape[-1])
    else:
        x2 = x.reshape(1, total)

    out2 = _copy_2d(x2)
    return out2.reshape(orig_shape)


if __name__ == "__main__":
    key = jax.random.PRNGKey(0)
    # NCHW input consistent with how Identity is used inside a conv net.
    x = jax.random.normal(key, (2, 4, 16, 16), dtype=jnp.float32)

    # True no-op path (module-equivalent forward).
    y0 = identity(x)
    assert y0.shape == x.shape and y0.dtype == x.dtype
    assert bool(jnp.all(y0 == x))

    # Pallas copy path (lane-dense, aliased).
    y1 = jax.block_until_ready(identity_copy(x))
    assert y1.shape == x.shape and y1.dtype == x.dtype
    assert bool(jnp.all(y1 == x))

    # Exercise the non-128-divisible fallback path as well.
    z = jax.random.normal(key, (3, 5, 7), dtype=jnp.float32)
    yz = jax.block_until_ready(identity_copy(z))
    assert yz.shape == z.shape and bool(jnp.all(yz == z))

    print("KERNEL_OK")
</pallas_src>

<mosaic_0001>
module attributes {stable_mosaic.version = 11 : i64} {
  func.func @_identity_kernel(%arg0: i32, %arg1: memref<1x2048xf32, #tpu.memory_space<vmem>>, %arg2: memref<1x2048xf32, #tpu.memory_space<vmem>>) attributes {dimension_semantics = [#tpu.dimension_semantics<parallel>], iteration_bounds = array<i64: 1>, scalar_prefetch = 0 : i64, scratch_operands = 0 : i64, tpu.core_type = #tpu.core_type<tc>, window_params = [{transform_indices = @transform_0, window_bounds = array<i64: 1, 2048>}, {transform_indices = @transform_1, window_bounds = array<i64: 1, 2048>}]} {
    %c0 = arith.constant 0 : index
    %c0_0 = arith.constant 0 : index
    %0 = vector.load %arg1[%c0, %c0_0] : memref<1x2048xf32, #tpu.memory_space<vmem>>, vector<1x2048xf32>
    %c0_1 = arith.constant 0 : index
    %c0_2 = arith.constant 0 : index
    %1 = vector.load %arg2[%c0_1, %c0_2] : memref<1x2048xf32, #tpu.memory_space<vmem>>, vector<1x2048xf32>
    tpu.vector_store %arg2[%c0_1, %c0_2], %0 {strides = array<i32>} : memref<1x2048xf32, #tpu.memory_space<vmem>>, vector<1x2048xf32>,
    return
  }
  func.func @transform_0(%arg0: i32) -> (i32, i32) {
    %c0_i32 = arith.constant 0 : i32
    %c0_i32_0 = arith.constant 0 : i32
    return %arg0, %c0_i32 : i32, i32
  }
  func.func @transform_1(%arg0: i32) -> (i32, i32) {
    %c0_i32 = arith.constant 0 : i32
    %c0_i32_0 = arith.constant 0 : i32
    return %arg0, %c0_i32 : i32, i32
  }
}

</mosaic_0001>

<bundles_post_ra>
// kernel: tpu_custom_call.1
= control target key start
LH: loop header
LB: loop body
LE: loop exit
PB: predicated region body
PF: predicated region fallthrough
CT: control target
= control target key end

     0   :  { %6 = vsyncpa [#allocation3], 0  ;;  %s104_s0 = inlined_call_operand.hbm [shape: f32[1,2048], index: 0, kind: input, shape index: {}, may-alias: {0,1}]   ;;  %s105_s1 = inlined_call_operand.hbm [shape: f32[1,2048], index: 1, kind: output, shape index: {}, may-alias: {0,1}]  }
   0x1   :  { %7 = vsyncpa [#allocation4], 0  ;;  %s86_s6 = smov [#allocation2]  }
   0x2   :  { %s14_s7 = sshll.u32 %s86_s6, 4  ;;  %s15_s7 = int_to_ptr.vmem [resolvable:$true] %s14_s7 }
   0x3   :  { %s50_s8 = scalar_lea.vmem %s15_s7, 256  ;;  %p55_p1 = scmp.lt.s32.totalorder %s15_s7, %s15_s7 }
   0x4   :  { %p51_p0 = scmp.ne.s32.totalorder %s15_s7, %s50_s8  ;;  %p56_p2 = scmp.lt.s32.totalorder %s50_s8, %s50_s8 }
   0x6   :  { %p57_p3 = por %p56_p2, %p55_p1 }
   0x8   :  { %p58_p4 = pnand %p57_p3, %p51_p0 }
   0xa   :  { %61 = shalt.err (!%p58_p4)
}
   0xb   :  { %17 = dma.hbm_to_vmem [thread:$0]  %s104_s0, 256, %s15_s7, [#allocation3]  }
   0xc   :  { %82 = dma.done.wait [#allocation3], 256  }
   0xd   :  { %83 = vsyncadd [#allocation3], 4294967040  ;;  %s87_s11 = smov [#allocation5]   ;;  %v21_v0 = vld [vmem:[#allocation2] sm:$0xff]  ;;  %v22_v1 = vld [vmem:[#allocation2 + $0x8] sm:$0xff] }
   0xe   :  { %s31_s12 = sshll.u32 %s87_s11, 4  ;;  %23 = vst [vmem:[#allocation5] sm:$0xff] %v21_v0  ;;  %24 = vst [vmem:[#allocation5 + $0x8] sm:$0xff] %v22_v1  ;;  %s32_s12 = int_to_ptr.vmem [resolvable:$true] %s31_s12 }
   0xf   :  { %s62_s13 = scalar_lea.vmem %s32_s12, 256  ;;  %p67_p6 = scmp.lt.s32.totalorder %s32_s12, %s32_s12 }
  0x10   :  { %p63_p5 = scmp.ne.s32.totalorder %s32_s12, %s62_s13  ;;  %p68_p7 = scmp.lt.s32.totalorder %s62_s13, %s62_s13 }
  0x12   :  { %p69_p8 = por %p68_p7, %p67_p6 }
  0x14   :  { %p70_p9 = pnand %p69_p8, %p63_p5 }
  0x16   :  { %73 = shalt.err (!%p70_p9)
}
  0x17   :  { %34 = dma.vmem_to_hbm [thread:$0]  %s32_s12, 256, %s105_s1, [#allocation4]  }
  0x18   :  { %84 = dma.done.wait [#allocation4], 256  }
  0x19   :  { %85 = vsyncadd [#allocation4], 4294967040 }
  0x1a   :  { %38 = vsyncpa [#allocation3], 1 }
  0x1b   :  { %39 = vsyncpa [#allocation4], 1 }

</bundles_post_ra>
